<compile_context>
chip_gen: v5e
topology: v5e:2x2
jax: 0.10.0
libtpu: 0.0.40
codegen_flags: <defaults>
</compile_context>

<pallas_src>
import math

import jax
import jax.numpy as jnp
from jax.experimental import pallas as pl
from jax.experimental.pallas import tpu as pltpu


_VMEM_BUDGET = 32 * 1024 * 1024   # conservative double-buffered tile budget (v7x: 64 MiB physical)
_LANE = 128


# ----------------------------------------------------------------------------
# Kernel: elementwise add of a positional-encoding tile onto an x tile.
# Works for both layouts:
#   lane-aligned : x (1, TN, D) + pe (TN, D)   (broadcast over leading batch dim)
#   lane-folded  : x (TB, TC)   + pe (1, TC)   (broadcast over batch rows)
# Pure VPU work, HBM-bandwidth bound; the grid provides DMA/compute overlap.
# ----------------------------------------------------------------------------
def _pe_add_kernel(x_ref, pe_ref, o_ref):
    o_ref[...] = x_ref[...] + pe_ref[...]
    # TODO(synk): training-mode nn.Dropout (Bernoulli mask + 1/(1-p) scale) not
    # implemented; eval-mode identity assumed.


def make_positional_encoding_table(d_model, max_len=5000, dtype=jnp.float32):
    """Replicates the torch buffer: pe[pos, 2i]=sin, pe[pos, 2i+1]=cos."""
    position = jnp.arange(max_len, dtype=jnp.float32)[:, None]
    div_term = jnp.exp(
        jnp.arange(0, d_model, 2, dtype=jnp.float32) * (-(math.log(10000.0) / d_model))
    )
    pe = jnp.zeros((max_len, d_model), dtype=jnp.float32)
    pe = pe.at[:, 0::2].set(jnp.sin(position * div_term))
    pe = pe.at[:, 1::2].set(jnp.cos(position * div_term))
    return pe.astype(dtype)


def _round_down(x, m):
    return (x // m) * m


def _round_up(x, m):
    return ((x + m - 1) // m) * m


def positional_encoding_forward(x, pe):
    """x: (B, N, d_model).  pe: (max_len, d_model) buffer.  Returns x + pe[:N]."""
    B, N, D = x.shape
    max_len = pe.shape[0]
    assert N <= max_len, "sequence length exceeds max_len of the PE buffer"

    itemsize = jnp.dtype(x.dtype).itemsize
    sub = max(8, 32 // itemsize)          # sublane multiple: 8 f32 / 16 bf16 / 32 int8
    pe = pe.astype(x.dtype)               # cast once; avoids per-tile promote/downcast

    if D % _LANE == 0:
        # ---- lane-aligned path: 3-D blocks, full pe buffer, no slice pass ----
        # per-step live VMEM ~ 2 buffers x (x + pe + out) = 6*TN*D*itemsize
        tn_cap = _VMEM_BUDGET // (6 * D * itemsize)
        TN = max(sub, min(1024, _round_down(tn_cap, sub), _round_up(N, sub)))
        grid = (pl.cdiv(N, TN), B)        # batch innermost -> pe tile revisit-skip
        footprint = 6 * TN * D * itemsize
        vmem_limit = int(min(48 * 1024 * 1024, max(8 * 1024 * 1024, 2 * footprint)))
        cost = pl.CostEstimate(
            flops=B * N * D,
            transcendentals=0,
            bytes_accessed=(2 * B * N * D + N * D) * itemsize,
        )
        return pl.pallas_call(
            _pe_add_kernel,
            out_shape=jax.ShapeDtypeStruct((B, N, D), x.dtype),
            grid_spec=pltpu.PrefetchScalarGridSpec(
                num_scalar_prefetch=0,
                grid=grid,
                in_specs=[
                    pl.BlockSpec((1, TN, D), lambda i, b: (b, i, 0)),   # x tile
                    pl.BlockSpec((TN, D), lambda i, b: (i, 0)),         # pe tile (batch-invariant)
                ],
                out_specs=pl.BlockSpec((1, TN, D), lambda i, b: (b, i, 0)),
            ),
            compiler_params=pltpu.CompilerParams(
                dimension_semantics=("parallel", "arbitrary"),
                vmem_limit_bytes=vmem_limit,
            ),
            cost_estimate=cost,
        )(x, pe)

    # ---- lane-dense fallback: D < 128 or not a multiple of 128 ----
    # The op is elementwise and pe broadcasts only over batch, so fold sequence
    # rows into the lane axis for full-width (unmasked) vector stores.
    W = N * D
    pe_flat = jax.lax.slice(pe, (0, 0), (N, D)).reshape(1, W)   # tiny: only N*D elems
    x_flat = x.reshape(B, W)

    TB = B if B <= 8 else 8
    # per-step live VMEM ~ 2 buffers x (x + pe + out) = 2*(2*TB+1)*TC*itemsize
    tc_cap = _VMEM_BUDGET // (2 * (2 * TB + 1) * itemsize)
    TC = max(_LANE, min(_round_down(tc_cap, _LANE), _round_up(W, _LANE), 16384))
    grid = (pl.cdiv(W, TC), pl.cdiv(B, TB))   # batch innermost -> pe chunk reuse
    footprint = 2 * (2 * TB + 1) * TC * itemsize
    vmem_limit = int(min(48 * 1024 * 1024, max(8 * 1024 * 1024, 2 * footprint)))
    cost = pl.CostEstimate(
        flops=B * W,
        transcendentals=0,
        bytes_accessed=(2 * B * W + W) * itemsize,
    )
    out_flat = pl.pallas_call(
        _pe_add_kernel,
        out_shape=jax.ShapeDtypeStruct((B, W), x.dtype),
        grid_spec=pltpu.PrefetchScalarGridSpec(
            num_scalar_prefetch=0,
            grid=grid,
            in_specs=[
                pl.BlockSpec((TB, TC), lambda c, b: (b, c)),   # x chunk
                pl.BlockSpec((1, TC), lambda c, b: (0, c)),    # pe chunk (batch-invariant)
            ],
            out_specs=pl.BlockSpec((TB, TC), lambda c, b: (b, c)),
        ),
        compiler_params=pltpu.CompilerParams(
            dimension_semantics=("parallel", "arbitrary"),
            vmem_limit_bytes=vmem_limit,
        ),
        cost_estimate=cost,
    )(x_flat, pe_flat)
    return out_flat.reshape(B, N, D)


def _reference(x, pe):
    """Pure-JAX reference mirroring the torch forward (eval mode)."""
    N = x.shape[-2]
    return x + pe[:N].astype(x.dtype)


if __name__ == "__main__":
    max_len = 5000
    key = jax.random.PRNGKey(0)

    # Case 1: small d_model (D=32) -> lane-dense folded path.
    B, N, D = 2, 8, 32
    x = jax.random.normal(key, (B, N, D), dtype=jnp.float32)
    pe = make_positional_encoding_table(D, max_len)
    out = positional_encoding_forward(x, pe)
    jax.block_until_ready(out)
    assert out.shape == (B, N, D)
    assert jnp.allclose(out, _reference(x, pe), atol=1e-6, rtol=1e-6)

    # Case 2: lane-aligned d_model (D=128) -> 3-D blocked path, full pe buffer,
    # batch-innermost grid (pe revisit-skip).
    B2, N2, D2 = 2, 16, 128
    x2 = jax.random.normal(jax.random.fold_in(key, 1), (B2, N2, D2), dtype=jnp.float32)
    pe2 = make_positional_encoding_table(D2, max_len)
    out2 = positional_encoding_forward(x2, pe2)
    jax.block_until_ready(out2)
    assert out2.shape == (B2, N2, D2)
    assert jnp.allclose(out2, _reference(x2, pe2), atol=1e-6, rtol=1e-6)

    print("KERNEL_OK")
</pallas_src>

<mosaic_0001>
module attributes {stable_mosaic.version = 11 : i64} {
  func.func @_pe_add_kernel(%arg0: i32, %arg1: i32, %arg2: memref<2x256xf32, #tpu.memory_space<vmem>>, %arg3: memref<1x256xf32, #tpu.memory_space<vmem>>, %arg4: memref<2x256xf32, #tpu.memory_space<vmem>>) attributes {dimension_semantics = [#tpu.dimension_semantics<parallel>, #tpu.dimension_semantics<arbitrary>], iteration_bounds = array<i64: 1, 1>, scalar_prefetch = 0 : i64, scratch_operands = 0 : i64, tpu.core_type = #tpu.core_type<tc>, window_params = [{transform_indices = @transform_0, window_bounds = array<i64: 2, 256>}, {transform_indices = @transform_1, window_bounds = array<i64: 1, 256>}, {transform_indices = @transform_2, window_bounds = array<i64: 2, 256>}]} {
    %c0 = arith.constant 0 : index
    %c0_0 = arith.constant 0 : index
    %0 = vector.load %arg2[%c0, %c0_0] : memref<2x256xf32, #tpu.memory_space<vmem>>, vector<2x256xf32>
    %c0_1 = arith.constant 0 : index
    %c0_2 = arith.constant 0 : index
    %1 = vector.load %arg3[%c0_1, %c0_2] : memref<1x256xf32, #tpu.memory_space<vmem>>, vector<1x256xf32>
    %2 = vector.broadcast %1 : vector<1x256xf32> to vector<2x256xf32>
    %3 = arith.addf %0, %2 : vector<2x256xf32>
    %c0_3 = arith.constant 0 : index
    %c0_4 = arith.constant 0 : index
    %4 = vector.load %arg4[%c0_3, %c0_4] : memref<2x256xf32, #tpu.memory_space<vmem>>, vector<2x256xf32>
    tpu.vector_store %arg4[%c0_3, %c0_4], %3 {strides = array<i32>} : memref<2x256xf32, #tpu.memory_space<vmem>>, vector<2x256xf32>,
    return
  }
  func.func @transform_0(%arg0: i32, %arg1: i32) -> (i32, i32) {
    %c0_i32 = arith.constant 0 : i32
    return %arg1, %arg0 : i32, i32
  }
  func.func @transform_1(%arg0: i32, %arg1: i32) -> (i32, i32) {
    %c0_i32 = arith.constant 0 : i32
    %c0_i32_0 = arith.constant 0 : i32
    return %c0_i32, %arg0 : i32, i32
  }
  func.func @transform_2(%arg0: i32, %arg1: i32) -> (i32, i32) {
    %c0_i32 = arith.constant 0 : i32
    return %arg1, %arg0 : i32, i32
  }
}

</mosaic_0001>

<bundles_post_ra>
// kernel: tpu_custom_call.1
= control target key start
LH: loop header
LB: loop body
LE: loop exit
PB: predicated region body
PF: predicated region fallthrough
CT: control target
= control target key end

     0   :  { %7 = vsyncpa [#allocation3], 0  ;;  %s177_s0 = inlined_call_operand.hbm [shape: f32[2,256], index: 0, kind: input, shape index: {}]   ;;  %s178_s1 = inlined_call_operand.hbm [shape: f32[1,256], index: 1, kind: input, shape index: {}]   ;;  %s179_s2 = inlined_call_operand.hbm [shape: f32[2,256], index: 2, kind: output, shape index: {}]  }
   0x1   :  { %8 = vsyncpa [#allocation6], 0 }
   0x2   :  { %9 = vsyncpa [#allocation4], 0  ;;  %s15_s11 = sshll.u32 %s177_s0, 4  ;;  %s150_s12 = smov [#allocation2]   ;;  %s16_s11 = int_to_ptr.hbm [resolvable:$true] %s15_s11 }
   0x3   :  { %s17_s13 = sshll.u32 %s150_s12, 4  ;;  %s26_s16 = sshll.u32 %s178_s1, 4  ;;  %s18_s13 = int_to_ptr.vmem [resolvable:$true] %s17_s13  ;;  %s27_s16 = int_to_ptr.hbm [resolvable:$true] %s26_s16 }
   0x4   :  { %20 = dma.hbm_to_vmem [thread:$0]  %s16_s11, 64, %s18_s13, [#allocation3]  }
   0x5   :  { %s151_s17 = smov [#allocation5]  }
   0x6   :  { %s28_s18 = sshll.u32 %s151_s17, 4  ;;  %s29_s18 = int_to_ptr.vmem [resolvable:$true] %s28_s18 }
   0x7   :  { %31 = dma.hbm_to_vmem [thread:$0]  %s27_s16, 32, %s29_s18, [#allocation6]  }
   0x8   :  { %144 = dma.done.wait [#allocation3], 64  }
   0x9   :  { %145 = vsyncadd [#allocation3], 4294967232 }
   0xa   :  { %146 = dma.done.wait [#allocation6], 32  }
   0xb   :  { %147 = vsyncadd [#allocation6], 4294967264  ;;  %v41_v0 = vld [vmem:[#allocation5] sm:$0x3]  ;;  %vm46_vm0 = vcmask 1041408   ;;  %s152_s0 = smov [#allocation7]  }
   0xc   :  { %v43_v1 = vperm.slane %v41_v0, 0  ;;  %v44_v2 = vperm.slane %v41_v0, 1  ;;  %v40_v3 = vld [vmem:[#allocation2] sm:$0xf]  ;;  %s56_s19 = sshll.u32 %s152_s0, 4  ;;  %s58_s21 = sshll.u32 %s179_s2, 4  ;;  %s57_s19 = int_to_ptr.vmem [resolvable:$true] %s56_s19  ;;  %s59_s21 = int_to_ptr.hbm [resolvable:$true] %s58_s21 }
   0xe   :  { %v45_v4 = vrot.slane %v44_v2, 6 }
  0x10   :  { %v47_v5 = vsel %vm46_vm0, %v43_v1, %v45_v4 }
  0x11   :  { %v49_v6 = vadd.f32 %v47_v5, %v40_v3 }
  0x13   :  { %50 = vst [vmem:[#allocation7] sm:$0xf] %v49_v6 }
  0x14   :  { %61 = dma.vmem_to_hbm [thread:$0]  %s57_s19, 64, %s59_s21, [#allocation4]  }
  0x15   :  { %148 = dma.done.wait [#allocation4], 64  }
  0x16   :  { %149 = vsyncadd [#allocation4], 4294967232 }
  0x17   :  { %66 = vsyncpa [#allocation3], 1 }
  0x18   :  { %67 = vsyncpa [#allocation6], 1 }
  0x19   :  { %68 = vsyncpa [#allocation4], 1 }

</bundles_post_ra>
